<compile_context>
chip_gen: v7x
topology: tpu7x:2x2x1
jax: 0.10.0
libtpu: 0.0.40
codegen_flags: <defaults>
</compile_context>

<pallas_src>
import jax
import jax.numpy as jnp
from jax import lax
from jax.experimental import pallas as pl
from jax.experimental.pallas import tpu as pltpu

LANES = 128          # TPU lane width (last dim of every block)
SUBLANES = 8         # f32 sublane count; row alignment of the kernel prefix
MAX_TILE_R = 4096    # rows per grid step -> 2 MiB f32 block per input
NUM_SHARDS = 2       # leading "parallel" grid axis (engages both v7x cores)

# accumulator slot indices in the (5, 8, 128) partial-sum block
_SX, _SY, _SXY, _SXX, _SYY = range(5)


def _make_partial_sums_kernel(total_rows, tile_r, blocks_per_shard):
    """Builds a kernel that accumulates per-shard partial sums.

    The output block (1, 5, 8, LANES) is used directly as the accumulator; it
    stays resident in VMEM across the inner ("arbitrary") grid axis and is
    written back to HBM once per shard.
    """

    def kernel(x_ref, y_ref, acc_ref):
        s = pl.program_id(0)
        i = pl.program_id(1)

        @pl.when(i == 0)
        def _():
            acc_ref[...] = jnp.zeros_like(acc_ref)

        # Valid rows of this (shard, step) block, in ROW units so int32 never
        # overflows even for huge tensors.  Uses the *unclamped* global block
        # index so duplicate trailing blocks (when total_blocks is not a
        # multiple of the shard count) contribute nothing.
        rem_rows = total_rows - (s * blocks_per_shard + i) * tile_r

        def accumulate(x, y):
            # (tile_r, 128) -> (tile_r//8, 8, 128): trailing (8, 128) chunks
            # align with vreg tiles, so reducing over axis 0 is pure VPU work
            # (no XLU in the hot loop).  Sums go straight into the five
            # accumulator slots -- no jnp.stack / concat temporaries.
            xr = x.reshape(tile_r // SUBLANES, SUBLANES, LANES)
            yr = y.reshape(tile_r // SUBLANES, SUBLANES, LANES)
            acc_ref[0, _SX, :, :] += jnp.sum(xr, axis=0)
            acc_ref[0, _SY, :, :] += jnp.sum(yr, axis=0)
            acc_ref[0, _SXY, :, :] += jnp.sum(xr * yr, axis=0)
            acc_ref[0, _SXX, :, :] += jnp.sum(xr * xr, axis=0)
            acc_ref[0, _SYY, :, :] += jnp.sum(yr * yr, axis=0)

        @pl.when(rem_rows >= tile_r)
        def _():
            # Hot path: full block, no masking.  Inputs are cast in-kernel so
            # bf16/f16 tensors stream at half the HBM bytes.
            accumulate(x_ref[...].astype(jnp.float32),
                       y_ref[...].astype(jnp.float32))

        @pl.when(rem_rows < tile_r)
        def _():
            # Edge / duplicate block: rows >= rem_rows either repeat data that
            # was already counted or come from a block window extending past
            # the array (unspecified values), so select them to zero BEFORE
            # any arithmetic (a pure select is safe on NaN/garbage input).
            row = lax.broadcasted_iota(jnp.int32, (tile_r, LANES), 0)
            mask = row < rem_rows
            accumulate(jnp.where(mask, x_ref[...].astype(jnp.float32), 0.0),
                       jnp.where(mask, y_ref[...].astype(jnp.float32), 0.0))

    return kernel


def _partial_sums_pallas(x_rows, y_rows):
    """Streams (rows, 128) inputs through the TPU; returns (5,) f32 sums."""
    total_rows = x_rows.shape[0]                      # multiple of SUBLANES
    tile_r = min(MAX_TILE_R, total_rows)              # multiple of SUBLANES
    total_blocks = pl.cdiv(total_rows, tile_r)
    num_shards = min(NUM_SHARDS, total_blocks)
    blocks_per_shard = pl.cdiv(total_blocks, num_shards)
    last_block = total_blocks - 1

    def in_map(s, i):
        # Clamp so dummy trailing iterations read an in-bounds (fully masked)
        # block instead of relying on OOB-window behavior.
        return (jnp.minimum(s * blocks_per_shard + i, last_block), 0)

    kernel = _make_partial_sums_kernel(total_rows, tile_r, blocks_per_shard)

    in_bytes = total_rows * LANES * (x_rows.dtype.itemsize
                                     + y_rows.dtype.itemsize)
    out_bytes = num_shards * 5 * SUBLANES * LANES * 4
    cost = pl.CostEstimate(flops=8 * total_rows * LANES,
                           transcendentals=0,
                           bytes_accessed=in_bytes + out_bytes)

    partials = pl.pallas_call(
        kernel,
        out_shape=jax.ShapeDtypeStruct((num_shards, 5, SUBLANES, LANES),
                                       jnp.float32),
        grid_spec=pltpu.PrefetchScalarGridSpec(
            num_scalar_prefetch=0,
            grid=(num_shards, blocks_per_shard),
            in_specs=[
                pl.BlockSpec((tile_r, LANES), in_map),
                pl.BlockSpec((tile_r, LANES), in_map),
            ],
            out_specs=pl.BlockSpec((1, 5, SUBLANES, LANES),
                                   lambda s, i: (s, 0, 0, 0)),
        ),
        compiler_params=pltpu.CompilerParams(
            dimension_semantics=("parallel", "arbitrary"),
            vmem_limit_bytes=48 << 20),
        cost_estimate=cost,
    )(x_rows, y_rows)
    # Single tiny cross-lane/shard reduce, done once outside the kernel.
    return jnp.sum(partials, axis=(0, 2, 3))


def inv_correlation_coefficient_loss(y_true, y_pred):
    assert y_true.shape == y_pred.shape
    n = int(y_true.size)
    # TODO(synk): N == 1 yields 0/0 in the unbiased std (matches torch's NaN).

    x_flat = y_true.reshape(-1)
    y_flat = y_pred.reshape(-1)

    align = SUBLANES * LANES                          # 1024 elements
    prefix = (n // align) * align                     # kernel-streamed part

    if prefix > 0:
        if prefix == n:
            x_head, y_head = x_flat, y_flat
        else:
            x_head, y_head = x_flat[:prefix], y_flat[:prefix]
        sums = _partial_sums_pallas(
            x_head.reshape(prefix // LANES, LANES),
            y_head.reshape(prefix // LANES, LANES))
    else:
        sums = jnp.zeros((5,), jnp.float32)

    if prefix != n:
        # Sub-1024-element ragged tail: folded in with plain-JAX partial sums
        # instead of a whole-array pad+copy (which would double HBM traffic
        # for a bandwidth-bound kernel).
        xt = x_flat[prefix:].astype(jnp.float32)
        yt = y_flat[prefix:].astype(jnp.float32)
        sums = sums + jnp.stack([jnp.sum(xt), jnp.sum(yt), jnp.sum(xt * yt),
                                 jnp.sum(xt * xt), jnp.sum(yt * yt)])

    # ~20-flop finalize in plain JAX.
    nf = jnp.float32(n)
    sx, sy = sums[_SX], sums[_SY]
    sxy, sxx, syy = sums[_SXY], sums[_SXX], sums[_SYY]
    mean_x = sx / nf
    mean_y = sy / nf
    # covariance with mean-over-N (biased), exactly as torch.mean(...)
    cov = sxy / nf - mean_x * mean_y
    # torch.std default: unbiased (divisor N-1); clamp vs f32 cancellation.
    # TODO(synk): for |mean| >> std a shifted/two-pass variance would be more
    # robust than E[x^2]-E[x]^2; the clamp only prevents NaN.
    var_x = jnp.maximum(sxx - nf * mean_x * mean_x, 0.0) / (nf - 1.0)
    var_y = jnp.maximum(syy - nf * mean_y * mean_y, 0.0) / (nf - 1.0)
    denom = jnp.sqrt(var_x) * jnp.sqrt(var_y) + jnp.float32(1e-5)
    corr = cov / denom
    return jnp.float32(1.0) - corr * corr


def _reference(y_true, y_pred):
    """Pure-JAX reference matching the PyTorch semantics."""
    x = y_true.astype(jnp.float32)
    y = y_pred.astype(jnp.float32)
    mean_x = jnp.mean(x)
    mean_y = jnp.mean(y)
    cov = jnp.mean((x - mean_x) * (y - mean_y))
    std_x = jnp.std(x, ddof=1)
    std_y = jnp.std(y, ddof=1)
    corr = cov / (std_x * std_y + 1e-5)
    return 1.0 - corr ** 2


if __name__ == "__main__":
    key = jax.random.PRNGKey(0)
    k1, k2 = jax.random.split(key)
    # Small NCHW-like regression target.
    y_true = jax.random.normal(k1, (2, 4, 16, 16), dtype=jnp.float32)
    noise = jax.random.normal(k2, (2, 4, 16, 16), dtype=jnp.float32)
    y_pred = 0.7 * y_true + 0.3 * noise

    loss = inv_correlation_coefficient_loss(y_true, y_pred)
    loss = jax.block_until_ready(loss)

    ref = _reference(y_true, y_pred)
    assert jnp.allclose(loss, ref, rtol=1e-4, atol=1e-5), (loss, ref)
    print("KERNEL_OK")
</pallas_src>

<mosaic_0001>
module attributes {stable_mosaic.version = 11 : i64} {
  func.func @kernel(%arg0: i32, %arg1: i32, %arg2: memref<16x128xf32, #tpu.memory_space<vmem>>, %arg3: memref<16x128xf32, #tpu.memory_space<vmem>>, %arg4: memref<1x5x8x128xf32, #tpu.memory_space<vmem>>) attributes {dimension_semantics = [#tpu.dimension_semantics<parallel>, #tpu.dimension_semantics<arbitrary>], iteration_bounds = array<i64: 1, 1>, scalar_prefetch = 0 : i64, scratch_operands = 0 : i64, tpu.core_type = #tpu.core_type<tc>, window_params = [{transform_indices = @transform_0, window_bounds = array<i64: 16, 128>}, {transform_indices = @transform_1, window_bounds = array<i64: 16, 128>}, {transform_indices = @transform_2, window_bounds = array<i64: 1, 5, 8, 128>}]} {
    %c0_i32 = arith.constant 0 : i32
    %0 = arith.cmpi eq, %arg1, %c0_i32 : i32
    %1 = arith.extui %0 : i1 to i32
    %c0_i32_0 = arith.constant 0 : i32
    %2 = arith.cmpi ne, %1, %c0_i32_0 : i32
    scf.if %2 {
      %cst = arith.constant 0.000000e+00 : f32
      %13 = vector.broadcast %cst : f32 to vector<1x5x8x128xf32>
      %c0 = arith.constant 0 : index
      %c0_6 = arith.constant 0 : index
      %c0_7 = arith.constant 0 : index
      %c0_8 = arith.constant 0 : index
      %14 = vector.load %arg4[%c0, %c0_6, %c0_7, %c0_8] : memref<1x5x8x128xf32, #tpu.memory_space<vmem>>, vector<1x5x8x128xf32>
      tpu.vector_store %arg4[%c0, %c0_6, %c0_7, %c0_8], %13 {strides = array<i32>} : memref<1x5x8x128xf32, #tpu.memory_space<vmem>>, vector<1x5x8x128xf32>,
    } else {
    }
    %c1_i32 = arith.constant 1 : i32
    %3 = arith.muli %arg0, %c1_i32 : i32
    %4 = arith.addi %3, %arg1 : i32
    %c16_i32 = arith.constant 16 : i32
    %5 = arith.muli %4, %c16_i32 : i32
    %c16_i32_1 = arith.constant 16 : i32
    %6 = arith.subi %c16_i32_1, %5 : i32
    %c16_i32_2 = arith.constant 16 : i32
    %7 = arith.cmpi sge, %6, %c16_i32_2 : i32
    %8 = arith.extui %7 : i1 to i32
    %c0_i32_3 = arith.constant 0 : i32
    %9 = arith.cmpi ne, %8, %c0_i32_3 : i32
    scf.if %9 {
      %c0 = arith.constant 0 : index
      %c0_6 = arith.constant 0 : index
      %13 = vector.load %arg2[%c0, %c0_6] : memref<16x128xf32, #tpu.memory_space<vmem>>, vector<16x128xf32>
      %c0_7 = arith.constant 0 : index
      %c0_8 = arith.constant 0 : index
      %14 = vector.load %arg3[%c0_7, %c0_8] : memref<16x128xf32, #tpu.memory_space<vmem>>, vector<16x128xf32>
      %15 = vector.shape_cast %13 : vector<16x128xf32> to vector<2x8x128xf32>
      %16 = vector.shape_cast %14 : vector<16x128xf32> to vector<2x8x128xf32>
      %c0_9 = arith.constant 0 : index
      %c0_10 = arith.constant 0 : index
      %c0_11 = arith.constant 0 : index
      %c0_12 = arith.constant 0 : index
      %17 = vector.load %arg4[%c0_9, %c0_10, %c0_11, %c0_12] : memref<1x5x8x128xf32, #tpu.memory_space<vmem>>, vector<1x1x8x128xf32>
      %18 = vector.shape_cast %17 : vector<1x1x8x128xf32> to vector<8x128xf32>
      %cst = arith.constant dense<0.000000e+00> : vector<8x128xf32>
      %19 = vector.multi_reduction <add>, %15, %cst [0] : vector<2x8x128xf32> to vector<8x128xf32>
      %20 = arith.addf %18, %19 : vector<8x128xf32>
      %c0_13 = arith.constant 0 : index
      %c0_14 = arith.constant 0 : index
      %c0_15 = arith.constant 0 : index
      %c0_16 = arith.constant 0 : index
      %21 = vector.load %arg4[%c0_13, %c0_14, %c0_15, %c0_16] : memref<1x5x8x128xf32, #tpu.memory_space<vmem>>, vector<1x1x8x128xf32>
      %22 = vector.shape_cast %21 : vector<1x1x8x128xf32> to vector<8x128xf32>
      %23 = vector.shape_cast %20 : vector<8x128xf32> to vector<1x1x8x128xf32>
      tpu.vector_store %arg4[%c0_13, %c0_14, %c0_15, %c0_16], %23 {strides = array<i32>} : memref<1x5x8x128xf32, #tpu.memory_space<vmem>>, vector<1x1x8x128xf32>,
      %c0_17 = arith.constant 0 : index
      %c1 = arith.constant 1 : index
      %c0_18 = arith.constant 0 : index
      %c0_19 = arith.constant 0 : index
      %24 = vector.load %arg4[%c0_17, %c1, %c0_18, %c0_19] : memref<1x5x8x128xf32, #tpu.memory_space<vmem>>, vector<1x1x8x128xf32>
      %25 = vector.shape_cast %24 : vector<1x1x8x128xf32> to vector<8x128xf32>
      %cst_20 = arith.constant dense<0.000000e+00> : vector<8x128xf32>
      %26 = vector.multi_reduction <add>, %16, %cst_20 [0] : vector<2x8x128xf32> to vector<8x128xf32>
      %27 = arith.addf %25, %26 : vector<8x128xf32>
      %c0_21 = arith.constant 0 : index
      %c1_22 = arith.constant 1 : index
      %c0_23 = arith.constant 0 : index
      %c0_24 = arith.constant 0 : index
      %28 = vector.load %arg4[%c0_21, %c1_22, %c0_23, %c0_24] : memref<1x5x8x128xf32, #tpu.memory_space<vmem>>, vector<1x1x8x128xf32>
      %29 = vector.shape_cast %28 : vector<1x1x8x128xf32> to vector<8x128xf32>
      %30 = vector.shape_cast %27 : vector<8x128xf32> to vector<1x1x8x128xf32>
      tpu.vector_store %arg4[%c0_21, %c1_22, %c0_23, %c0_24], %30 {strides = array<i32>} : memref<1x5x8x128xf32, #tpu.memory_space<vmem>>, vector<1x1x8x128xf32>,
      %c0_25 = arith.constant 0 : index
      %c2 = arith.constant 2 : index
      %c0_26 = arith.constant 0 : index
      %c0_27 = arith.constant 0 : index
      %31 = vector.load %arg4[%c0_25, %c2, %c0_26, %c0_27] : memref<1x5x8x128xf32, #tpu.memory_space<vmem>>, vector<1x1x8x128xf32>
      %32 = vector.shape_cast %31 : vector<1x1x8x128xf32> to vector<8x128xf32>
      %33 = arith.mulf %15, %16 : vector<2x8x128xf32>
      %cst_28 = arith.constant dense<0.000000e+00> : vector<8x128xf32>
      %34 = vector.multi_reduction <add>, %33, %cst_28 [0] : vector<2x8x128xf32> to vector<8x128xf32>
      %35 = arith.addf %32, %34 : vector<8x128xf32>
      %c0_29 = arith.constant 0 : index
      %c2_30 = arith.constant 2 : index
      %c0_31 = arith.constant 0 : index
      %c0_32 = arith.constant 0 : index
      %36 = vector.load %arg4[%c0_29, %c2_30, %c0_31, %c0_32] : memref<1x5x8x128xf32, #tpu.memory_space<vmem>>, vector<1x1x8x128xf32>
      %37 = vector.shape_cast %36 : vector<1x1x8x128xf32> to vector<8x128xf32>
      %38 = vector.shape_cast %35 : vector<8x128xf32> to vector<1x1x8x128xf32>
      tpu.vector_store %arg4[%c0_29, %c2_30, %c0_31, %c0_32], %38 {strides = array<i32>} : memref<1x5x8x128xf32, #tpu.memory_space<vmem>>, vector<1x1x8x128xf32>,
      %c0_33 = arith.constant 0 : index
      %c3 = arith.constant 3 : index
      %c0_34 = arith.constant 0 : index
      %c0_35 = arith.constant 0 : index
      %39 = vector.load %arg4[%c0_33, %c3, %c0_34, %c0_35] : memref<1x5x8x128xf32, #tpu.memory_space<vmem>>, vector<1x1x8x128xf32>
      %40 = vector.shape_cast %39 : vector<1x1x8x128xf32> to vector<8x128xf32>
      %41 = arith.mulf %15, %15 : vector<2x8x128xf32>
      %cst_36 = arith.constant dense<0.000000e+00> : vector<8x128xf32>
      %42 = vector.multi_reduction <add>, %41, %cst_36 [0] : vector<2x8x128xf32> to vector<8x128xf32>
      %43 = arith.addf %40, %42 : vector<8x128xf32>
      %c0_37 = arith.constant 0 : index
      %c3_38 = arith.constant 3 : index
      %c0_39 = arith.constant 0 : index
      %c0_40 = arith.constant 0 : index
      %44 = vector.load %arg4[%c0_37, %c3_38, %c0_39, %c0_40] : memref<1x5x8x128xf32, #tpu.memory_space<vmem>>, vector<1x1x8x128xf32>
      %45 = vector.shape_cast %44 : vector<1x1x8x128xf32> to vector<8x128xf32>
      %46 = vector.shape_cast %43 : vector<8x128xf32> to vector<1x1x8x128xf32>
      tpu.vector_store %arg4[%c0_37, %c3_38, %c0_39, %c0_40], %46 {strides = array<i32>} : memref<1x5x8x128xf32, #tpu.memory_space<vmem>>, vector<1x1x8x128xf32>,
      %c0_41 = arith.constant 0 : index
      %c4 = arith.constant 4 : index
      %c0_42 = arith.constant 0 : index
      %c0_43 = arith.constant 0 : index
      %47 = vector.load %arg4[%c0_41, %c4, %c0_42, %c0_43] : memref<1x5x8x128xf32, #tpu.memory_space<vmem>>, vector<1x1x8x128xf32>
      %48 = vector.shape_cast %47 : vector<1x1x8x128xf32> to vector<8x128xf32>
      %49 = arith.mulf %16, %16 : vector<2x8x128xf32>
      %cst_44 = arith.constant dense<0.000000e+00> : vector<8x128xf32>
      %50 = vector.multi_reduction <add>, %49, %cst_44 [0] : vector<2x8x128xf32> to vector<8x128xf32>
      %51 = arith.addf %48, %50 : vector<8x128xf32>
      %c0_45 = arith.constant 0 : index
      %c4_46 = arith.constant 4 : index
      %c0_47 = arith.constant 0 : index
      %c0_48 = arith.constant 0 : index
      %52 = vector.load %arg4[%c0_45, %c4_46, %c0_47, %c0_48] : memref<1x5x8x128xf32, #tpu.memory_space<vmem>>, vector<1x1x8x128xf32>
      %53 = vector.shape_cast %52 : vector<1x1x8x128xf32> to vector<8x128xf32>
      %54 = vector.shape_cast %51 : vector<8x128xf32> to vector<1x1x8x128xf32>
      tpu.vector_store %arg4[%c0_45, %c4_46, %c0_47, %c0_48], %54 {strides = array<i32>} : memref<1x5x8x128xf32, #tpu.memory_space<vmem>>, vector<1x1x8x128xf32>,
    } else {
    }
    %c16_i32_4 = arith.constant 16 : i32
    %10 = arith.cmpi slt, %6, %c16_i32_4 : i32
    %11 = arith.extui %10 : i1 to i32
    %c0_i32_5 = arith.constant 0 : i32
    %12 = arith.cmpi ne, %11, %c0_i32_5 : i32
    scf.if %12 {
      %13 = tpu.iota {dimensions = array<i32: 0>} : vector<16x128xi32>
      %14 = vector.broadcast %6 : i32 to vector<16x128xi32>
      %15 = arith.cmpi slt, %13, %14 : vector<16x128xi32>
      %c0 = arith.constant 0 : index
      %c0_6 = arith.constant 0 : index
      %16 = vector.load %arg2[%c0, %c0_6] : memref<16x128xf32, #tpu.memory_space<vmem>>, vector<16x128xf32>
      %cst = arith.constant 0.000000e+00 : f32
      %17 = vector.broadcast %cst : f32 to vector<16x128xf32>
      %18 = arith.select %15, %16, %17 : vector<16x128xi1>, vector<16x128xf32>
      %c0_7 = arith.constant 0 : index
      %c0_8 = arith.constant 0 : index
      %19 = vector.load %arg3[%c0_7, %c0_8] : memref<16x128xf32, #tpu.memory_space<vmem>>, vector<16x128xf32>
      %cst_9 = arith.constant 0.000000e+00 : f32
      %20 = vector.broadcast %cst_9 : f32 to vector<16x128xf32>
      %21 = arith.select %15, %19, %20 : vector<16x128xi1>, vector<16x128xf32>
      %22 = vector.shape_cast %18 : vector<16x128xf32> to vector<2x8x128xf32>
      %23 = vector.shape_cast %21 : vector<16x128xf32> to vector<2x8x128xf32>
      %c0_10 = arith.constant 0 : index
      %c0_11 = arith.constant 0 : index
      %c0_12 = arith.constant 0 : index
      %c0_13 = arith.constant 0 : index
      %24 = vector.load %arg4[%c0_10, %c0_11, %c0_12, %c0_13] : memref<1x5x8x128xf32, #tpu.memory_space<vmem>>, vector<1x1x8x128xf32>
      %25 = vector.shape_cast %24 : vector<1x1x8x128xf32> to vector<8x128xf32>
      %cst_14 = arith.constant dense<0.000000e+00> : vector<8x128xf32>
      %26 = vector.multi_reduction <add>, %22, %cst_14 [0] : vector<2x8x128xf32> to vector<8x128xf32>
      %27 = arith.addf %25, %26 : vector<8x128xf32>
      %c0_15 = arith.constant 0 : index
      %c0_16 = arith.constant 0 : index
      %c0_17 = arith.constant 0 : index
      %c0_18 = arith.constant 0 : index
      %28 = vector.load %arg4[%c0_15, %c0_16, %c0_17, %c0_18] : memref<1x5x8x128xf32, #tpu.memory_space<vmem>>, vector<1x1x8x128xf32>
      %29 = vector.shape_cast %28 : vector<1x1x8x128xf32> to vector<8x128xf32>
      %30 = vector.shape_cast %27 : vector<8x128xf32> to vector<1x1x8x128xf32>
      tpu.vector_store %arg4[%c0_15, %c0_16, %c0_17, %c0_18], %30 {strides = array<i32>} : memref<1x5x8x128xf32, #tpu.memory_space<vmem>>, vector<1x1x8x128xf32>,
      %c0_19 = arith.constant 0 : index
      %c1 = arith.constant 1 : index
      %c0_20 = arith.constant 0 : index
      %c0_21 = arith.constant 0 : index
      %31 = vector.load %arg4[%c0_19, %c1, %c0_20, %c0_21] : memref<1x5x8x128xf32, #tpu.memory_space<vmem>>, vector<1x1x8x128xf32>
      %32 = vector.shape_cast %31 : vector<1x1x8x128xf32> to vector<8x128xf32>
      %cst_22 = arith.constant dense<0.000000e+00> : vector<8x128xf32>
      %33 = vector.multi_reduction <add>, %23, %cst_22 [0] : vector<2x8x128xf32> to vector<8x128xf32>
      %34 = arith.addf %32, %33 : vector<8x128xf32>
      %c0_23 = arith.constant 0 : index
      %c1_24 = arith.constant 1 : index
      %c0_25 = arith.constant 0 : index
      %c0_26 = arith.constant 0 : index
      %35 = vector.load %arg4[%c0_23, %c1_24, %c0_25, %c0_26] : memref<1x5x8x128xf32, #tpu.memory_space<vmem>>, vector<1x1x8x128xf32>
      %36 = vector.shape_cast %35 : vector<1x1x8x128xf32> to vector<8x128xf32>
      %37 = vector.shape_cast %34 : vector<8x128xf32> to vector<1x1x8x128xf32>
      tpu.vector_store %arg4[%c0_23, %c1_24, %c0_25, %c0_26], %37 {strides = array<i32>} : memref<1x5x8x128xf32, #tpu.memory_space<vmem>>, vector<1x1x8x128xf32>,
      %c0_27 = arith.constant 0 : index
      %c2 = arith.constant 2 : index
      %c0_28 = arith.constant 0 : index
      %c0_29 = arith.constant 0 : index
      %38 = vector.load %arg4[%c0_27, %c2, %c0_28, %c0_29] : memref<1x5x8x128xf32, #tpu.memory_space<vmem>>, vector<1x1x8x128xf32>
      %39 = vector.shape_cast %38 : vector<1x1x8x128xf32> to vector<8x128xf32>
      %40 = arith.mulf %22, %23 : vector<2x8x128xf32>
      %cst_30 = arith.constant dense<0.000000e+00> : vector<8x128xf32>
      %41 = vector.multi_reduction <add>, %40, %cst_30 [0] : vector<2x8x128xf32> to vector<8x128xf32>
      %42 = arith.addf %39, %41 : vector<8x128xf32>
      %c0_31 = arith.constant 0 : index
      %c2_32 = arith.constant 2 : index
      %c0_33 = arith.constant 0 : index
      %c0_34 = arith.constant 0 : index
      %43 = vector.load %arg4[%c0_31, %c2_32, %c0_33, %c0_34] : memref<1x5x8x128xf32, #tpu.memory_space<vmem>>, vector<1x1x8x128xf32>
      %44 = vector.shape_cast %43 : vector<1x1x8x128xf32> to vector<8x128xf32>
      %45 = vector.shape_cast %42 : vector<8x128xf32> to vector<1x1x8x128xf32>
      tpu.vector_store %arg4[%c0_31, %c2_32, %c0_33, %c0_34], %45 {strides = array<i32>} : memref<1x5x8x128xf32, #tpu.memory_space<vmem>>, vector<1x1x8x128xf32>,
      %c0_35 = arith.constant 0 : index
      %c3 = arith.constant 3 : index
      %c0_36 = arith.constant 0 : index
      %c0_37 = arith.constant 0 : index
      %46 = vector.load %arg4[%c0_35, %c3, %c0_36, %c0_37] : memref<1x5x8x128xf32, #tpu.memory_space<vmem>>, vector<1x1x8x128xf32>
      %47 = vector.shape_cast %46 : vector<1x1x8x128xf32> to vector<8x128xf32>
      %48 = arith.mulf %22, %22 : vector<2x8x128xf32>
      %cst_38 = arith.constant dense<0.000000e+00> : vector<8x128xf32>
      %49 = vector.multi_reduction <add>, %48, %cst_38 [0] : vector<2x8x128xf32> to vector<8x128xf32>
      %50 = arith.addf %47, %49 : vector<8x128xf32>
      %c0_39 = arith.constant 0 : index
      %c3_40 = arith.constant 3 : index
      %c0_41 = arith.constant 0 : index
      %c0_42 = arith.constant 0 : index
      %51 = vector.load %arg4[%c0_39, %c3_40, %c0_41, %c0_42] : memref<1x5x8x128xf32, #tpu.memory_space<vmem>>, vector<1x1x8x128xf32>
      %52 = vector.shape_cast %51 : vector<1x1x8x128xf32> to vector<8x128xf32>
      %53 = vector.shape_cast %50 : vector<8x128xf32> to vector<1x1x8x128xf32>
      tpu.vector_store %arg4[%c0_39, %c3_40, %c0_41, %c0_42], %53 {strides = array<i32>} : memref<1x5x8x128xf32, #tpu.memory_space<vmem>>, vector<1x1x8x128xf32>,
      %c0_43 = arith.constant 0 : index
      %c4 = arith.constant 4 : index
      %c0_44 = arith.constant 0 : index
      %c0_45 = arith.constant 0 : index
      %54 = vector.load %arg4[%c0_43, %c4, %c0_44, %c0_45] : memref<1x5x8x128xf32, #tpu.memory_space<vmem>>, vector<1x1x8x128xf32>
      %55 = vector.shape_cast %54 : vector<1x1x8x128xf32> to vector<8x128xf32>
      %56 = arith.mulf %23, %23 : vector<2x8x128xf32>
      %cst_46 = arith.constant dense<0.000000e+00> : vector<8x128xf32>
      %57 = vector.multi_reduction <add>, %56, %cst_46 [0] : vector<2x8x128xf32> to vector<8x128xf32>
      %58 = arith.addf %55, %57 : vector<8x128xf32>
      %c0_47 = arith.constant 0 : index
      %c4_48 = arith.constant 4 : index
      %c0_49 = arith.constant 0 : index
      %c0_50 = arith.constant 0 : index
      %59 = vector.load %arg4[%c0_47, %c4_48, %c0_49, %c0_50] : memref<1x5x8x128xf32, #tpu.memory_space<vmem>>, vector<1x1x8x128xf32>
      %60 = vector.shape_cast %59 : vector<1x1x8x128xf32> to vector<8x128xf32>
      %61 = vector.shape_cast %58 : vector<8x128xf32> to vector<1x1x8x128xf32>
      tpu.vector_store %arg4[%c0_47, %c4_48, %c0_49, %c0_50], %61 {strides = array<i32>} : memref<1x5x8x128xf32, #tpu.memory_space<vmem>>, vector<1x1x8x128xf32>,
    } else {
    }
    return
  }
  func.func @transform_0(%arg0: i32, %arg1: i32) -> (i32, i32) {
    %c1_i32 = arith.constant 1 : i32
    %0 = arith.muli %arg0, %c1_i32 : i32
    %1 = arith.addi %0, %arg1 : i32
    %c0_i32 = arith.constant 0 : i32
    %2 = arith.minsi %1, %c0_i32 : i32
    %c0_i32_0 = arith.constant 0 : i32
    %c0_i32_1 = arith.constant 0 : i32
    return %2, %c0_i32_0 : i32, i32
  }
  func.func @transform_1(%arg0: i32, %arg1: i32) -> (i32, i32) {
    %c1_i32 = arith.constant 1 : i32
    %0 = arith.muli %arg0, %c1_i32 : i32
    %1 = arith.addi %0, %arg1 : i32
    %c0_i32 = arith.constant 0 : i32
    %2 = arith.minsi %1, %c0_i32 : i32
    %c0_i32_0 = arith.constant 0 : i32
    %c0_i32_1 = arith.constant 0 : i32
    return %2, %c0_i32_0 : i32, i32
  }
  func.func @transform_2(%arg0: i32, %arg1: i32) -> (i32, i32, i32, i32) {
    %c0_i32 = arith.constant 0 : i32
    %c0_i32_0 = arith.constant 0 : i32
    %c0_i32_1 = arith.constant 0 : i32
    %c0_i32_2 = arith.constant 0 : i32
    return %arg0, %c0_i32, %c0_i32_0, %c0_i32_1 : i32, i32, i32, i32
  }
}

</mosaic_0001>

<bundles_post_ra>
// kernel: tpu_custom_call.1
= control target key start
LH: loop header
LB: loop body
LE: loop exit
PB: predicated region body
PF: predicated region fallthrough
CT: control target
= control target key end

     0   :  { %7 = vsyncpa [#allocation3], 0  ;;  %s323_s0 = inlined_call_operand.hbm [shape: f32[16,128], index: 0, kind: input, shape index: {}]   ;;  %s324_s1 = inlined_call_operand.hbm [shape: f32[16,128], index: 1, kind: input, shape index: {}]   ;;  %s325_s2 = inlined_call_operand.hbm [shape: f32[1,5,8,128], index: 2, kind: output, shape index: {}]  }
   0x1   :  { %8 = vsyncpa [#allocation6], 0 }
   0x2   :  { %9 = vsyncpa [#allocation4], 0  ;;  %s258_s9 = smov [#allocation2]   ;;  %s186_s13 = scalar_lea.hbm %s323_s0, 256 }
   0x3   :  { %s21_s10 = sshll.u32 %s258_s9, 4  ;;  %p187_p0 = scmp.ne.s32.totalorder %s323_s0, %s186_s13  ;;  %s22_s10 = int_to_ptr.vmem [resolvable:$true] %s21_s10 }
   0x4   :  { %p190_p1 = scmp.lt.u32.totalorder %s186_s13, %s323_s0 }
   0x6   :  { %p192_p2 = pnand %p190_p1, %p187_p0 }
   0x8   :  { %195 = shalt.err (!%p192_p2)
}
   0x9   :  { %s196_s18 = scalar_lea.vmem %s22_s10, 256  ;;  %p201_p4 = scmp.lt.s32.totalorder %s22_s10, %s22_s10 }
   0xa   :  { %p197_p3 = scmp.ne.s32.totalorder %s22_s10, %s196_s18  ;;  %p202_p5 = scmp.lt.s32.totalorder %s196_s18, %s196_s18 }
   0xc   :  { %p203_p6 = por %p202_p5, %p201_p4 }
   0xe   :  { %p204_p7 = pnand %p203_p6, %p197_p3 }
  0x10   :  { %207 = shalt.err (!%p204_p7)
}
  0x11   :  { %s259_s19 = smov 128   ;;  %s260_s20 = smov 8  }
  0x12   :  { %27 = dma.hbm_to_vmem [thread:$0]  %s323_s0, 256, %s22_s10, [#allocation3], %s259_s19, %s259_s19, %s260_s20  }
  0x13   :  { %s261_s23 = smov [#allocation5]   ;;  %s208_s27 = scalar_lea.hbm %s324_s1, 256 }
  0x14   :  { %s39_s24 = sshll.u32 %s261_s23, 4  ;;  %p209_p8 = scmp.ne.s32.totalorder %s324_s1, %s208_s27  ;;  %s40_s24 = int_to_ptr.vmem [resolvable:$true] %s39_s24 }
  0x15   :  { %p212_p9 = scmp.lt.u32.totalorder %s208_s27, %s324_s1 }
  0x17   :  { %p214_p10 = pnand %p212_p9, %p209_p8 }
  0x19   :  { %217 = shalt.err (!%p214_p10)
}
  0x1a   :  { %s218_s4 = scalar_lea.vmem %s40_s24, 256  ;;  %p223_p12 = scmp.lt.s32.totalorder %s40_s24, %s40_s24 }
  0x1b   :  { %p219_p11 = scmp.ne.s32.totalorder %s40_s24, %s218_s4  ;;  %p224_p13 = scmp.lt.s32.totalorder %s218_s4, %s218_s4 }
  0x1d   :  { %p225_p0 = por %p224_p13, %p223_p12 }
  0x1f   :  { %p226_p1 = pnand %p225_p0, %p219_p11 }
  0x21   :  { %229 = shalt.err (!%p226_p1)
}
  0x22   :  { %45 = dma.hbm_to_vmem [thread:$0]  %s324_s1, 256, %s40_s24, [#allocation6], %s259_s19, %s259_s19, %s260_s20  }
  0x23   :  { %252 = dma.done.wait [#allocation3], 256  }
  0x24   :  { %253 = vsyncadd [#allocation3], 4294967040 }
  0x25   :  { %254 = dma.done.wait [#allocation6], 256  }
  0x26   :  { %255 = vsyncadd [#allocation6], 4294967040  ;;  %v76_v0 = vld [vmem:[#allocation2] sm:$0xff]  ;;  %v77_v1 = vld [vmem:[#allocation2 + $0x8] sm:$0xff]  ;;  %s262_s6 = smov [#allocation7]  }
  0x27   :  { %v78_v2 = vld [vmem:[#allocation5] sm:$0xff]  ;;  %v81_v3 = vadd.f32 %v77_v1, %v76_v0  ;;  %v79_v4 = vld [vmem:[#allocation5 + $0x8] sm:$0xff]  ;;  %v98_v6 = vmul.f32 %v76_v0, %v76_v0  ;;  %v99_v7 = vmul.f32 %v77_v1, %v77_v1  ;;  %s163_s7 = sshll.u32 %s262_s6, 4  ;;  %s164_s7 = int_to_ptr.vmem [resolvable:$true] %s163_s7 }
  0x28   :  { %v91_v5 = vmul.f32 %v78_v2, %v76_v0  ;;  %v86_v8 = vadd.f32 %v79_v4, %v78_v2  ;;  %v92_v9 = vmul.f32 %v79_v4, %v77_v1  ;;  %v105_v10 = vmul.f32 %v78_v2, %v78_v2  ;;  %s230_s1 = scalar_lea.vmem %s164_s7, 640  ;;  %p235_p3 = scmp.lt.s32.totalorder %s164_s7, %s164_s7 }
  0x29   :  { %v106_v11 = vmul.f32 %v79_v4, %v79_v4  ;;  %v100_v12 = vadd.f32 %v99_v7, %v98_v6  ;;  %83 = vst [vmem:[#allocation7] sm:$0xff] %v81_v3  ;;  %p231_p2 = scmp.ne.s32.totalorder %s164_s7, %s230_s1  ;;  %p236_p4 = scmp.lt.s32.totalorder %s230_s1, %s230_s1 }
  0x2a   :  { %v93_v13 = vadd.f32 %v92_v9, %v91_v5  ;;  %88 = vst [vmem:[#allocation7 + $0x8] sm:$0xff] %v86_v8 }
  0x2b   :  { %v107_v14 = vadd.f32 %v106_v11, %v105_v10  ;;  %102 = vst [vmem:[#allocation7 + $0x18] sm:$0xff] %v100_v12  ;;  %p237_p5 = por %p236_p4, %p235_p3 }
  0x2c   :  { %95 = vst [vmem:[#allocation7 + $0x10] sm:$0xff] %v93_v13 }
  0x2d   :  { %109 = vst [vmem:[#allocation7 + $0x20] sm:$0xff] %v107_v14  ;;  %p238_p6 = pnand %p237_p5, %p231_p2 }
  0x2f   :  { %241 = shalt.err (!%p238_p6)
}
  0x30   :  { %s242_s10 = scalar_lea.hbm %s325_s2, 640 }
  0x31   :  { %p243_p7 = scmp.ne.s32.totalorder %s325_s2, %s242_s10  ;;  %p246_p8 = scmp.lt.u32.totalorder %s242_s10, %s325_s2 }
  0x33   :  { %p248_p9 = pnand %p246_p8, %p243_p7 }
  0x35   :  { %251 = shalt.err (!%p248_p9)
}
  0x36   :  { %169 = dma.vmem_to_hbm [thread:$0]  %s164_s7, 640, %s325_s2, [#allocation4], %s259_s19, %s259_s19, %s260_s20  }
  0x37   :  { %256 = dma.done.wait [#allocation4], 640  }
  0x38   :  { %257 = vsyncadd [#allocation4], 4294966656 }
  0x39   :  { %173 = vsyncpa [#allocation3], 1 }
  0x3a   :  { %174 = vsyncpa [#allocation6], 1 }
  0x3b   :  { %175 = vsyncpa [#allocation4], 1 }

</bundles_post_ra>
